<compile_context>
chip_gen: v6e
topology: v6e:2x2x1
jax: 0.10.0
libtpu: 0.0.40
codegen_flags: <defaults>
</compile_context>

<pallas_src>
import math

import jax
import jax.numpy as jnp
from jax.experimental import pallas as pl
from jax.experimental.pallas import tpu as pltpu


def head_kernel(q_ref, k_ref, v_ref, wqt_ref, wkt_ref, wvt_ref, o_ref,
                kp_ref, vp_ref):
    """Grid = (batch, query_tiles); query-tile axis is 'arbitrary'.

    q_ref: (tq, D) bf16; k_ref / v_ref: (S, D) bf16; w*t_ref: (D, D) bf16
    (in, out) with the 1/sqrt(d_k) scale pre-folded into wqt.
    kp_ref / vp_ref: (S, D) bf16 VMEM scratch holding the K / V projections,
    computed once per batch (at query-tile 0) and reused by later query tiles.
    """
    contract_lf = (((1,), (0,)), ((), ()))   # x @ W   (no transpose)
    contract_ll = (((1,), (1,)), ((), ()))   # x @ y^T (no transpose materialized)

    @pl.when(pl.program_id(1) == 0)
    def _project_kv():
        kp = jax.lax.dot_general(k_ref[...], wkt_ref[...],
                                 dimension_numbers=contract_lf,
                                 preferred_element_type=jnp.float32)   # (S, D)
        vp = jax.lax.dot_general(v_ref[...], wvt_ref[...],
                                 dimension_numbers=contract_lf,
                                 preferred_element_type=jnp.float32)   # (S, D)
        kp_ref[...] = kp.astype(kp_ref.dtype)
        vp_ref[...] = vp.astype(vp_ref.dtype)

    # Q projection (scale already folded into the weight): f32 accumulation.
    qp = jax.lax.dot_general(q_ref[...], wqt_ref[...],
                             dimension_numbers=contract_lf,
                             preferred_element_type=jnp.float32)       # (tq, D)

    # Scores: contract the last axes of qp and kp directly (MXU contracts either
    # operand natively — no kp.T materialized).
    att = jax.lax.dot_general(qp.astype(jnp.bfloat16), kp_ref[...],
                              dimension_numbers=contract_ll,
                              preferred_element_type=jnp.float32)      # (tq, S)

    # Numerically-stable softmax over the key axis, in f32.  Normalization is
    # deferred: scale the (tq, D) output by 1/sum instead of the (tq, S) tile.
    att = att - jnp.max(att, axis=-1, keepdims=True)
    e = jnp.exp(att)
    denom = jnp.sum(e, axis=-1, keepdims=True)                         # (tq, 1)

    out = jax.lax.dot_general(e.astype(jnp.bfloat16), vp_ref[...],
                              dimension_numbers=contract_lf,
                              preferred_element_type=jnp.float32)      # (tq, D)
    out = out * pl.reciprocal(denom, approx=True)
    o_ref[...] = out.astype(o_ref.dtype)


def _vmem_limit_bytes():
    """Scoped-VMEM limit: ~75% of the chip's physical per-core VMEM.

    ≈96 MiB on v5e/v6e (128 MiB physical), ≈48 MiB on v7x (64 MiB physical).
    Falls back to the conservative v7x figure if the query is unavailable.
    """
    physical = 64 * 1024 * 1024
    try:
        physical = int(getattr(pltpu.get_tpu_info(), "vmem_capacity_bytes",
                               physical))
    except Exception:
        pass
    return (physical * 3) // 4


def _choose_query_tile(S, D, vmem_budget):
    """VMEM-budget-aware query tile.

    Full sequence when the softmax temporaries fit; otherwise the largest
    128-multiple divisor of S that keeps ~3 f32 + 1 bf16 (tq, S) temporaries
    (with 2x slack for q/o tiles, qp and vregs) inside the budget, after
    reserving room for the resident kp/vp scratch, K/V blocks and weights.
    """
    resident = (2 + 4) * S * D * 2 + 3 * D * D * 2   # kp/vp + 2x(K,V) bufs + weights
    avail = max(vmem_budget - resident, vmem_budget // 8)
    bytes_per_q_row = S * (3 * 4 + 2) * 2            # softmax chain * 2x slack
    cap = max(avail // bytes_per_q_row, 16)
    if S <= cap:
        return S
    for cand in (2048, 1024, 512, 256, 128):
        if cand <= cap and S % cand == 0:
            return cand
    # No suitable divisor: fall back to the full sequence (see TODO above).
    return S


def head_forward(q, k, v, wq, wk, wv):
    """q, k, v: [B, S, D]; wq/wk/wv: [D, D] (out, in) as in torch.nn.Linear.

    Returns [B, S, D] in the dtype of `q`.
    """
    B, S, D = q.shape
    out_dtype = q.dtype
    compute_dtype = jnp.bfloat16

    vmem_limit = _vmem_limit_bytes()
    tq = _choose_query_tile(S, D, vmem_limit)
    n_q_tiles = S // tq

    # Cast activations/weights to bf16 at the boundary (halves HBM->VMEM DMA).
    # Pre-transpose the Linear weights once, and fold the 1/sqrt(d_k) softmax
    # scale into Wq (free — zero per-step cost in the kernel).
    scale = 1.0 / math.sqrt(float(D))
    qb = q.astype(compute_dtype)
    kb = k.astype(compute_dtype)
    vb = v.astype(compute_dtype)
    wqt = (wq.T * scale).astype(compute_dtype)
    wkt = wk.T.astype(compute_dtype)
    wvt = wv.T.astype(compute_dtype)

    q_spec = pl.BlockSpec((None, tq, D), lambda b, i: (b, i, 0))
    kv_spec = pl.BlockSpec((None, S, D), lambda b, i: (b, 0, 0))   # re-DMA'd only on batch change
    w_spec = pl.BlockSpec((D, D), lambda b, i: (0, 0))             # constant index -> DMA'd once
    o_spec = pl.BlockSpec((None, tq, D), lambda b, i: (b, i, 0))

    cost = pl.CostEstimate(
        flops=int(B * (3 * 2 * S * D * D + 2 * 2 * S * S * D)),
        transcendentals=int(B * S * S),
        bytes_accessed=int((3 * B * S * D + 3 * D * D) * 2
                           + B * S * D * jnp.dtype(out_dtype).itemsize),
    )

    return pl.pallas_call(
        head_kernel,
        out_shape=jax.ShapeDtypeStruct((B, S, D), out_dtype),
        grid_spec=pltpu.PrefetchScalarGridSpec(
            num_scalar_prefetch=0,
            grid=(B, n_q_tiles),
            in_specs=[q_spec, kv_spec, kv_spec, w_spec, w_spec, w_spec],
            out_specs=o_spec,
            scratch_shapes=[pltpu.VMEM((S, D), compute_dtype),   # kp cache
                            pltpu.VMEM((S, D), compute_dtype)],  # vp cache
        ),
        compiler_params=pltpu.CompilerParams(
            # Batch axis parallel (megacore); query-tile axis arbitrary so the
            # kp/vp scratch written at tile 0 is reused by later tiles.
            dimension_semantics=("parallel", "arbitrary"),
            vmem_limit_bytes=int(vmem_limit),
        ),
        cost_estimate=cost,
    )(qb, kb, vb, wqt, wkt, wvt)


def reference_head(q, k, v, wq, wk, wv):
    """Pure-JAX f32 reference matching the PyTorch module (mask=None)."""
    qp = jnp.einsum("bsd,od->bso", q, wq)
    kp = jnp.einsum("bsd,od->bso", k, wk)
    vp = jnp.einsum("bsd,od->bso", v, wv)
    scale = math.sqrt(kp.shape[2])
    att = jnp.einsum("bqd,bkd->bqk", qp, kp) / scale
    att = jax.nn.softmax(att, axis=2)
    return jnp.einsum("bqk,bkd->bqd", att, vp)


if __name__ == "__main__":
    key = jax.random.PRNGKey(0)
    B, S, D = 2, 8, 32   # batch, seq_len, hidden_dim

    k_q, k_k, k_v, k_wq, k_wk, k_wv = jax.random.split(key, 6)

    # Inputs (self-attention callers may pass the same tensor for q/k/v;
    # here we exercise distinct tensors).
    q_in = jax.random.normal(k_q, (B, S, D), dtype=jnp.float32)
    k_in = jax.random.normal(k_k, (B, S, D), dtype=jnp.float32)
    v_in = jax.random.normal(k_v, (B, S, D), dtype=jnp.float32)

    # Deterministic parameter init, shaped like nn.Linear(hidden, hidden).weight
    bound = 1.0 / math.sqrt(D)
    wq = jax.random.uniform(k_wq, (D, D), jnp.float32, -bound, bound)
    wk = jax.random.uniform(k_wk, (D, D), jnp.float32, -bound, bound)
    wv = jax.random.uniform(k_wv, (D, D), jnp.float32, -bound, bound)

    out = head_forward(q_in, k_in, v_in, wq, wk, wv)
    out = jax.block_until_ready(out)

    ref = reference_head(q_in, k_in, v_in, wq, wk, wv)
    assert out.shape == (B, S, D)
    # bf16 MXU operands + approx reciprocal => compare at bf16-level tolerance.
    max_err = jnp.max(jnp.abs(out - ref))
    assert jnp.allclose(out, ref, atol=5e-2, rtol=5e-2), f"max abs err {max_err}"

    print("KERNEL_OK")
</pallas_src>

<mosaic_0001>
module attributes {stable_mosaic.version = 11 : i64} {
  func.func @head_kernel(%arg0: i32, %arg1: i32, %arg2: memref<1x8x32xbf16, #tpu.memory_space<vmem>>, %arg3: memref<1x8x32xbf16, #tpu.memory_space<vmem>>, %arg4: memref<1x8x32xbf16, #tpu.memory_space<vmem>>, %arg5: memref<32x32xbf16, #tpu.memory_space<vmem>>, %arg6: memref<32x32xbf16, #tpu.memory_space<vmem>>, %arg7: memref<32x32xbf16, #tpu.memory_space<vmem>>, %arg8: memref<1x8x32xf32, #tpu.memory_space<vmem>>, %arg9: memref<8x32xbf16, #tpu.memory_space<vmem>>, %arg10: memref<8x32xbf16, #tpu.memory_space<vmem>>) attributes {dimension_semantics = [#tpu.dimension_semantics<parallel>, #tpu.dimension_semantics<arbitrary>], iteration_bounds = array<i64: 2, 1>, scalar_prefetch = 0 : i64, scratch_operands = 2 : i64, tpu.core_type = #tpu.core_type<tc>, window_params = [{transform_indices = @transform_0, window_bounds = array<i64: 1, 8, 32>}, {transform_indices = @transform_1, window_bounds = array<i64: 1, 8, 32>}, {transform_indices = @transform_2, window_bounds = array<i64: 1, 8, 32>}, {pipeline_mode = #tpu.pipeline_mode<synchronous>, transform_indices = @transform_3, window_bounds = array<i64: 32, 32>}, {pipeline_mode = #tpu.pipeline_mode<synchronous>, transform_indices = @transform_4, window_bounds = array<i64: 32, 32>}, {pipeline_mode = #tpu.pipeline_mode<synchronous>, transform_indices = @transform_5, window_bounds = array<i64: 32, 32>}, {transform_indices = @transform_6, window_bounds = array<i64: 1, 8, 32>}]} {
    %c0_i32 = arith.constant 0 : i32
    %0 = arith.cmpi eq, %arg1, %c0_i32 : i32
    %1 = arith.extui %0 : i1 to i32
    %c0_i32_0 = arith.constant 0 : i32
    %2 = arith.cmpi ne, %1, %c0_i32_0 : i32
    scf.if %2 {
      %c0_16 = arith.constant 0 : index
      %c0_17 = arith.constant 0 : index
      %c0_18 = arith.constant 0 : index
      %26 = vector.load %arg3[%c0_16, %c0_17, %c0_18] : memref<1x8x32xbf16, #tpu.memory_space<vmem>>, vector<1x8x32xbf16>
      %27 = vector.shape_cast %26 : vector<1x8x32xbf16> to vector<8x32xbf16>
      %c0_19 = arith.constant 0 : index
      %c0_20 = arith.constant 0 : index
      %28 = vector.load %arg6[%c0_19, %c0_20] : memref<32x32xbf16, #tpu.memory_space<vmem>>, vector<32x32xbf16>
      %cst_21 = arith.constant dense<0.000000e+00> : vector<8x32xf32>
      %29 = tpu.matmul %27, %28, %cst_21 {dimension_numbers = #tpu.dot_dimension_numbers<[1], [0], [0], [1], [0, 0, 1, 1], [], []>} : vector<8x32xbf16>, vector<32x32xbf16>, vector<8x32xf32> -> vector<8x32xf32>
      %c0_22 = arith.constant 0 : index
      %c0_23 = arith.constant 0 : index
      %c0_24 = arith.constant 0 : index
      %30 = vector.load %arg4[%c0_22, %c0_23, %c0_24] : memref<1x8x32xbf16, #tpu.memory_space<vmem>>, vector<1x8x32xbf16>
      %31 = vector.shape_cast %30 : vector<1x8x32xbf16> to vector<8x32xbf16>
      %c0_25 = arith.constant 0 : index
      %c0_26 = arith.constant 0 : index
      %32 = vector.load %arg7[%c0_25, %c0_26] : memref<32x32xbf16, #tpu.memory_space<vmem>>, vector<32x32xbf16>
      %cst_27 = arith.constant dense<0.000000e+00> : vector<8x32xf32>
      %33 = tpu.matmul %31, %32, %cst_27 {dimension_numbers = #tpu.dot_dimension_numbers<[1], [0], [0], [1], [0, 0, 1, 1], [], []>} : vector<8x32xbf16>, vector<32x32xbf16>, vector<8x32xf32> -> vector<8x32xf32>
      %34 = arith.truncf %29 : vector<8x32xf32> to vector<8x32xbf16>
      %c0_28 = arith.constant 0 : index
      %c0_29 = arith.constant 0 : index
      %35 = vector.load %arg9[%c0_28, %c0_29] : memref<8x32xbf16, #tpu.memory_space<vmem>>, vector<8x32xbf16>
      tpu.vector_store %arg9[%c0_28, %c0_29], %34 {strides = array<i32>} : memref<8x32xbf16, #tpu.memory_space<vmem>>, vector<8x32xbf16>,
      %36 = arith.truncf %33 : vector<8x32xf32> to vector<8x32xbf16>
      %c0_30 = arith.constant 0 : index
      %c0_31 = arith.constant 0 : index
      %37 = vector.load %arg10[%c0_30, %c0_31] : memref<8x32xbf16, #tpu.memory_space<vmem>>, vector<8x32xbf16>
      tpu.vector_store %arg10[%c0_30, %c0_31], %36 {strides = array<i32>} : memref<8x32xbf16, #tpu.memory_space<vmem>>, vector<8x32xbf16>,
    } else {
    }
    %c0 = arith.constant 0 : index
    %c0_1 = arith.constant 0 : index
    %c0_2 = arith.constant 0 : index
    %3 = vector.load %arg2[%c0, %c0_1, %c0_2] : memref<1x8x32xbf16, #tpu.memory_space<vmem>>, vector<1x8x32xbf16>
    %4 = vector.shape_cast %3 : vector<1x8x32xbf16> to vector<8x32xbf16>
    %c0_3 = arith.constant 0 : index
    %c0_4 = arith.constant 0 : index
    %5 = vector.load %arg5[%c0_3, %c0_4] : memref<32x32xbf16, #tpu.memory_space<vmem>>, vector<32x32xbf16>
    %cst = arith.constant dense<0.000000e+00> : vector<8x32xf32>
    %6 = tpu.matmul %4, %5, %cst {dimension_numbers = #tpu.dot_dimension_numbers<[1], [0], [0], [1], [0, 0, 1, 1], [], []>} : vector<8x32xbf16>, vector<32x32xbf16>, vector<8x32xf32> -> vector<8x32xf32>
    %7 = arith.truncf %6 : vector<8x32xf32> to vector<8x32xbf16>
    %c0_5 = arith.constant 0 : index
    %c0_6 = arith.constant 0 : index
    %8 = vector.load %arg9[%c0_5, %c0_6] : memref<8x32xbf16, #tpu.memory_space<vmem>>, vector<8x32xbf16>
    %cst_7 = arith.constant dense<0.000000e+00> : vector<8x8xf32>
    %9 = tpu.matmul %7, %8, %cst_7 {dimension_numbers = #tpu.dot_dimension_numbers<[1], [1], [0], [0], [0, 0, 1, 0], [], []>} : vector<8x32xbf16>, vector<8x32xbf16>, vector<8x8xf32> -> vector<8x8xf32>
    %cst_8 = arith.constant dense<0xFF800000> : vector<8xf32>
    %10 = vector.multi_reduction <maximumf>, %9, %cst_8 [1] : vector<8x8xf32> to vector<8xf32>
    %11 = vector.shape_cast %10 : vector<8xf32> to vector<8x1xf32>
    %12 = vector.broadcast %11 : vector<8x1xf32> to vector<8x8xf32>
    %13 = arith.subf %9, %12 : vector<8x8xf32>
    %14 = math.exp %13 : vector<8x8xf32>
    %cst_9 = arith.constant dense<0.000000e+00> : vector<8xf32>
    %15 = vector.multi_reduction <add>, %14, %cst_9 [1] : vector<8x8xf32> to vector<8xf32>
    %16 = vector.shape_cast %15 : vector<8xf32> to vector<8x1xf32>
    %17 = arith.truncf %14 : vector<8x8xf32> to vector<8x8xbf16>
    %c0_10 = arith.constant 0 : index
    %c0_11 = arith.constant 0 : index
    %18 = vector.load %arg10[%c0_10, %c0_11] : memref<8x32xbf16, #tpu.memory_space<vmem>>, vector<8x32xbf16>
    %cst_12 = arith.constant dense<0.000000e+00> : vector<8x32xf32>
    %19 = tpu.matmul %17, %18, %cst_12 {dimension_numbers = #tpu.dot_dimension_numbers<[1], [0], [0], [1], [0, 0, 1, 1], [], []>} : vector<8x8xbf16>, vector<8x32xbf16>, vector<8x32xf32> -> vector<8x32xf32>
    %20 = tpu.reciprocal %16 {approx = true} : vector<8x1xf32> -> vector<8x1xf32>
    %21 = vector.broadcast %20 : vector<8x1xf32> to vector<8x32xf32>
    %22 = arith.mulf %19, %21 : vector<8x32xf32>
    %c0_13 = arith.constant 0 : index
    %c0_14 = arith.constant 0 : index
    %c0_15 = arith.constant 0 : index
    %23 = vector.load %arg8[%c0_13, %c0_14, %c0_15] : memref<1x8x32xf32, #tpu.memory_space<vmem>>, vector<1x8x32xf32>
    %24 = vector.shape_cast %23 : vector<1x8x32xf32> to vector<8x32xf32>
    %25 = vector.shape_cast %22 : vector<8x32xf32> to vector<1x8x32xf32>
    tpu.vector_store %arg8[%c0_13, %c0_14, %c0_15], %25 {strides = array<i32>} : memref<1x8x32xf32, #tpu.memory_space<vmem>>, vector<1x8x32xf32>,
    return
  }
  func.func @transform_0(%arg0: i32, %arg1: i32) -> (i32, i32, i32) {
    %c0_i32 = arith.constant 0 : i32
    %c0_i32_0 = arith.constant 0 : i32
    return %arg0, %arg1, %c0_i32 : i32, i32, i32
  }
  func.func @transform_1(%arg0: i32, %arg1: i32) -> (i32, i32, i32) {
    %c0_i32 = arith.constant 0 : i32
    %c0_i32_0 = arith.constant 0 : i32
    %c0_i32_1 = arith.constant 0 : i32
    return %arg0, %c0_i32, %c0_i32_0 : i32, i32, i32
  }
  func.func @transform_2(%arg0: i32, %arg1: i32) -> (i32, i32, i32) {
    %c0_i32 = arith.constant 0 : i32
    %c0_i32_0 = arith.constant 0 : i32
    %c0_i32_1 = arith.constant 0 : i32
    return %arg0, %c0_i32, %c0_i32_0 : i32, i32, i32
  }
  func.func @transform_3(%arg0: i32, %arg1: i32) -> (i32, i32) {
    %c0_i32 = arith.constant 0 : i32
    %c0_i32_0 = arith.constant 0 : i32
    %c0_i32_1 = arith.constant 0 : i32
    return %c0_i32, %c0_i32_0 : i32, i32
  }
  func.func @transform_4(%arg0: i32, %arg1: i32) -> (i32, i32) {
    %c0_i32 = arith.constant 0 : i32
    %c0_i32_0 = arith.constant 0 : i32
    %c0_i32_1 = arith.constant 0 : i32
    return %c0_i32, %c0_i32_0 : i32, i32
  }
  func.func @transform_5(%arg0: i32, %arg1: i32) -> (i32, i32) {
    %c0_i32 = arith.constant 0 : i32
    %c0_i32_0 = arith.constant 0 : i32
    %c0_i32_1 = arith.constant 0 : i32
    return %c0_i32, %c0_i32_0 : i32, i32
  }
  func.func @transform_6(%arg0: i32, %arg1: i32) -> (i32, i32, i32) {
    %c0_i32 = arith.constant 0 : i32
    %c0_i32_0 = arith.constant 0 : i32
    return %arg0, %arg1, %c0_i32 : i32, i32, i32
  }
}

</mosaic_0001>

<bundles_post_ra>
// kernel: tpu_custom_call.1
= control target key start
LH: loop header
LB: loop body
LE: loop exit
PB: predicated region body
PF: predicated region fallthrough
CT: control target
= control target key end

     0   :  { %s1639_s0 = inlined_call_operand.hbm [shape: bf16[2,8,32], index: 0, kind: input, shape index: {}]   ;;  %s1640_s1 = inlined_call_operand.hbm [shape: bf16[2,8,32], index: 1, kind: input, shape index: {}]   ;;  %s1641_s2 = inlined_call_operand.hbm [shape: bf16[2,8,32], index: 2, kind: input, shape index: {}]   ;;  %s1642_s3 = inlined_call_operand.hbm [shape: bf16[32,32], index: 3, kind: input, shape index: {}]   ;;  %s1643_s4 = inlined_call_operand.hbm [shape: bf16[32,32], index: 4, kind: input, shape index: {}]   ;;  %s1644_s5 = inlined_call_operand.hbm [shape: bf16[32,32], index: 5, kind: input, shape index: {}]   ;;  %s1645_s6 = inlined_call_operand.hbm [shape: f32[2,8,32], index: 6, kind: output, shape index: {}]  }
   0x1   :  { %1661 = sst [smem:[#allocation25_spill]] %s1640_s1 }
   0x2   :  { %1662 = sst [smem:[#allocation26_spill]] %s1642_s3 }
   0x3   :  { %1663 = sst [smem:[#allocation27_spill]] %s1643_s4 }
   0x4   :  { %11 = vsyncpa [#allocation5], 0 }
   0x5   :  { %13 = vsyncpa [#allocation5 + $0x1], 0 }
   0x6   :  { %14 = vsyncpa [#allocation8], 0 }
   0x7   :  { %16 = vsyncpa [#allocation8 + $0x1], 0 }
   0x8   :  { %17 = vsyncpa [#allocation11], 0 }
   0x9   :  { %18 = vsyncpa [#allocation14], 0 }
   0xa   :  { %19 = vsyncpa [#allocation6], 0 }
   0xb   :  { %21 = vsyncpa [#allocation6 + $0x1], 0  ;;  %s1372_s21 = smov 0   ;;  %s1374_s22 = smov 0  }
   0xc   :  { %s1376_s23 = smov 0   ;;  %s1378_s24 = smov 0  }
   0xd   :  { %s1380_s25 = smov 0   ;;  %s1382_s26 = smov 0  }
   0xe LB: > { %1664 = sst [smem:[#allocation21_spill]] %s1320_s25  ;;  %s1403_s27 = sadd.s32 4294967295, %s1324_s26   ;;  %s1324_s26 = sphi %s1382_s26, %s27_s26   ;;  %s1320_s25 = sphi %s1380_s25, %s1697_s25   ;;  %s1316_s24 = sphi %s1378_s24, %s1696_s24   ;;  %s1312_s23 = sphi %s1376_s23, %s1700_s23   ;;  %s1308_s22 = sphi %s1374_s22, %s1699_s22   ;;  %s1304_s21 = sphi %s1372_s21, %s1698_s21  }
   0xf   : > { %1665 = sst [smem:[#allocation22_spill]] %s1324_s26  ;;  %s869_s28 = sadd.s32 4294967294, %s1324_s26  }
  0x10   : > { %p61_p0 = scmp.ne.s32.totalorder %s1308_s22, %s1304_s21  ;;  %p1655_p1 = scmp.eq.s32.totalorder %s1403_s27, 0 }
  0x11   : > { %p208_p3 = scmp.eq.s32.totalorder %s869_s28, 1  ;;  %p870_p5 = scmp.ge.s32.totalorder %s1324_s26, 1 }
  0x12   : > { %p1412_p4 = por %p1655_p1, %p61_p0  ;;  %p215_p7 = scmp.lt.s32.totalorder %s1324_s26, 3 }
  0x13   : > { %p1417_p6 = por %p208_p3, %p61_p0  ;;  %s1326_s8 = smov [#allocation10]  }
  0x14   : > { %s1666_s29 = scalar_select %p1412_p4, 1, 0 }
  0x15   : > { %s1667_s30 = scalar_select %p1417_p6, 1, 0 }
  0x16   : > { %p1422_p8 = pnand %p870_p5, %p215_p7  ;;  %s227_s9 = sshll.u32 %s1326_s8, 4  ;;  %s228_s9 = int_to_ptr.vmem [resolvable:$true] %s227_s9 }
  0x17   : > { %s39_s11 = sadd.s32 1, %s1320_s25  ;;  %s1081_s12 = scalar_lea.vmem %s228_s9, 256 }
  0x18   : > { %s1668_s7 = scalar_select %p1422_p8, 1, 0 }
  0x19   : > { %p973_p9 = pneg %p1422_p8  ;;  %p1082_p13 = scmp.ne.s32.totalorder %s228_s9, %s1081_s12 }
  0x1a   : > { %p1089_p5 = scmp.lt.s32.totalorder %s228_s9, %s228_s9  ;;  %p1090_p7 = scmp.lt.s32.totalorder %s1081_s12, %s1081_s12 }
  0x1b   : > { %p1431_p11 = pnand %p973_p9, %p1655_p1 }
  0x1c   : > { %p1091_p2 = por %p1090_p7, %p1089_p5 }
  0x1d   : > { %p1656_p12 = pneg %p1431_p11 }
  0x1f   : > { %p1084_p0 = pnand %p1082_p13, %p1656_p12 }
  0x21   : > { %p1085_p3 = pneg %p1084_p0 }
  0x23   : > { %p1092_p10 = pnand %p1091_p2, %p1085_p3 }
  0x25   : > { %1095 = shalt.err (!%p1092_p10)
}
  0x26   : > { %s1646_s13 = smov 64   ;;  %s1648_s14 = smov 4  }
  0x27   : > { %s1670_s3 = sld [smem:[#allocation26_spill]]  ;;  %p41_p2 = scmp.ge.s32.totalorder %s39_s11, 2 }
  0x28   : > { %s48_s17 = sadd.s32 1, %s1312_s23  ;;  %p55_p9 = scmp.ne.s32.totalorder %s1312_s23, %s1308_s22 }
  0x29   : > { %p56_p10 = scmp.eq.s32.totalorder %s1324_s26, 0  ;;  %s1702_s11 = smov (%p41_p2, %s39_s11), 0 }
  0x2a   : > { %1671 = sst [smem:[#allocation23_spill]] %s1702_s11  ;;  %p1672_p0 = scmp.eq.s32.totalorder %s1403_s27, 1 }
  0x2b   : > { %p57_p13 = por %p56_p10, %p55_p9  ;;  %s43_s19 = ssub.s32 %s1320_s25, %s1702_s11 }
  0x2c   : > { %p1457_p3 = por %p1672_p0, %p55_p9  ;;  %p1000_p5 = scmp.lt.s32.totalorder %s1324_s26, 2 }
  0x2d   : > { %976 = dma.hbm_to_vmem [thread:$0]  (!%p1431_p11), %s1670_s3, 256, %s228_s9, [#allocation11], %s1646_s13, %s1646_s13, %s1648_s14  }
  0x2e   : > { %s1673_s18 = scalar_select %p1457_p3, 1, 0 }
  0x2f   : > { %p46_p7 = scmp.eq.s32.totalorder %s43_s19, 0  ;;  %s1650_s20 = sand.u32 1, %s1312_s23  }
  0x30   : > { %s1467_s28 = sshll.u32 %s1650_s20, 2  ;;  %s1470_s8 = sshll.u32 %s1320_s25, 6 }
  0x31   : > { %s1473_s9 = scalar_select %p46_p7, %s1312_s23, %s48_s17  }
  0x32   : > { %p1475_p2 = pnand %p1000_p5, %p57_p13  ;;  %s286_s15 = sand.u32 1, %s1324_s26  }
  0x33   : > { %1674 = sst [smem:[#allocation24_spill]] %s1473_s9  ;;  %s290_s14 = scalar_lea.vmem [#allocation7], %s1467_s28 }
  0x34   : > { %s1676_s1 = sld [smem:[#allocation25_spill]]  ;;  %s297_s20 = sshll.u32 %s290_s14, 4  ;;  %s298_s20 = int_to_ptr.vmem [resolvable:$true] %s297_s20 }
  0x35   : > { %s1329_s3 = smov [#allocation12]   ;;  %s1485_s25 = scalar_lea.sflag [#allocation8], %s286_s15 }
  0x36   : > { %s240_s11 = sshll.u32 %s1329_s3, 4  ;;  %p1657_p9 = pneg %p1475_p2  ;;  %s241_s11 = int_to_ptr.vmem [resolvable:$true] %s240_s11 }
  0x37   : > { %s1109_s17 = scalar_lea.vmem %s298_s20, 64  ;;  %s1330_s9 = smov [#allocation7]  }
  0x38   : > { %p1110_p10 = scmp.ne.s32.totalorder %s298_s20, %s1109_s17  ;;  %s1114_s26 = sshll.u32 %s1330_s9, 4  ;;  %s1115_s26 = int_to_ptr.vmem [resolvable:$false] %s1114_s26 }
  0x39   : > { %s1116_s13 = scalar_lea.vmem %s1115_s26, 128  ;;  %p1117_p5 = scmp.lt.s32.totalorder %s298_s20, %s1115_s26 }
  0x3a   : > { %s295_s19 = scalar_lea.hbm %s1676_s1, %s1470_s8  ;;  %p1112_p13 = pnand %p1110_p10, %p1657_p9 }
  0x3b   : > { %p1118_p7 = scmp.lt.s32.totalorder %s1116_s13, %s1109_s17 }
  0x3c   : > { %p1113_p0 = pneg %p1112_p13 }
  0x3d   : > { %p1119_p1 = por %p1118_p7, %p1117_p5 }
  0x3f   : > { %p1120_p12 = pnand %p1119_p1, %p1113_p0 }
  0x41   : > { %1123 = shalt.err (!%p1120_p12)
}
  0x42   : > { %989 = dma.hbm_to_vmem [thread:$0]  (!%p1475_p2), %s295_s19, 64, %s298_s20, %s1485_s25  }
  0x43   : > { %s1135_s3 = scalar_lea.vmem %s241_s11, 256  ;;  %p1677_p10 = pneg %p1431_p11 }
  0x44   : > { %p1136_p6 = scmp.ne.s32.totalorder %s241_s11, %s1135_s3  ;;  %p1143_p3 = scmp.lt.s32.totalorder %s241_s11, %s241_s11 }
  0x45   : > { %p1144_p4 = scmp.lt.s32.totalorder %s1135_s3, %s1135_s3 }
  0x46   : > { %p1138_p13 = pnand %p1136_p6, %p1677_p10 }
  0x47   : > { %p1145_p8 = por %p1144_p4, %p1143_p3 }
  0x48   : > { %p1139_p9 = pneg %p1138_p13 }
  0x4a   : > { %p1146_p5 = pnand %p1145_p8, %p1139_p9 }
  0x4c   : > { %1149 = shalt.err (!%p1146_p5)
}
  0x4d   : > { %s1678_s26 = smov 4   ;;  %s1679_s14 = smov 64  }
  0x4e   : > { %s1680_s4 = sld [smem:[#allocation27_spill]]  ;;  %s1331_s20 = smov [#allocation13]  }
  0x4f   : > { %s253_s16 = sshll.u32 %s1331_s20, 4  ;;  %p1681_p6 = pmov %p1677_p10  ;;  %s254_s16 = int_to_ptr.vmem [resolvable:$true] %s253_s16 }
  0x50   : > { %s1161_s19 = scalar_lea.vmem %s254_s16, 256  ;;  %p1169_p12 = scmp.lt.s32.totalorder %s254_s16, %s254_s16 }
  0x51   : > { %p1162_p1 = scmp.ne.s32.totalorder %s254_s16, %s1161_s19  ;;  %p1170_p3 = scmp.lt.s32.totalorder %s1161_s19, %s1161_s19 }
  0x53   : > { %p1164_p4 = pnand %p1162_p1, %p1681_p6  ;;  %p1171_p9 = por %p1170_p3, %p1169_p12 }
  0x54   : > { %979 = dma.hbm_to_vmem [thread:$0]  (!%p1431_p11), %s1680_s4, 256, %s241_s11, [#allocation11], %s1679_s14, %s1679_s14, %s1678_s26  }
  0x55   : > { %p1165_p8 = pneg %p1164_p4 }
  0x57   : > { %p1172_p0 = pnand %p1171_p9, %p1165_p8 }
  0x59   : > { %1175 = shalt.err (!%p1172_p0)
}
  0x5a   : > { %982 = dma.hbm_to_vmem [thread:$0]  (!%p1431_p11), %s1644_s5, 256, %s254_s16, [#allocation14], %s1679_s14, %s1679_s14, %s1678_s26  }
  0x5b   : > { %s277_s9 = scalar_lea.hbm %s1639_s0, %s1470_s8  ;;  %s271_s15 = scalar_lea.vmem [#allocation4], %s1467_s28 }
  0x5c   : > { %s279_s20 = sshll.u32 %s271_s15, 4  ;;  %s1682_s19 = sand.u32 1, %s1312_s23   ;;  %s280_s20 = int_to_ptr.vmem [resolvable:$true] %s279_s20 }
  0x5d   : > { %s268_s10 = scalar_lea.sflag [#allocation5], %s1682_s19  ;;  %s1189_s1 = scalar_lea.vmem %s280_s20, 64 }
  0x5e   : > { %p1190_p7 = scmp.ne.s32.totalorder %s280_s20, %s1189_s1  ;;  %p1683_p10 = pneg %p1475_p2 }
  0x5f   : > { %s1332_s11 = smov [#allocation4]  }
  0x60   : > { %p1192_p13 = pnand %p1190_p7, %p1683_p10  ;;  %s1194_s17 = sshll.u32 %s1332_s11, 4  ;;  %s1195_s17 = int_to_ptr.vmem [resolvable:$false] %s1194_s17 }
  0x61   : > { %s1196_s4 = scalar_lea.vmem %s1195_s17, 128  ;;  %p1197_p11 = scmp.lt.s32.totalorder %s280_s20, %s1195_s17 }
  0x62   : > { %p1193_p5 = pneg %p1192_p13  ;;  %p1198_p1 = scmp.lt.s32.totalorder %s1196_s4, %s1189_s1 }
  0x64   : > { %p1199_p6 = por %p1198_p1, %p1197_p11 }
  0x66   : > { %p1200_p4 = pnand %p1199_p6, %p1193_p5 }
  0x68   : > { %1203 = shalt.err (!%p1200_p4)
}
  0x69   : > { %986 = dma.hbm_to_vmem [thread:$0]  (!%p1475_p2), %s277_s9, 64, %s280_s20, %s268_s10  }
  0x6a   : > { %s313_s16 = scalar_lea.hbm %s1641_s2, %s1470_s8  ;;  %s308_s13 = scalar_lea.vmem [#allocation9], %s1467_s28 }
  0x6b   : > { %s315_s3 = sshll.u32 %s308_s13, 4  ;;  %p1684_p12 = pmov %p1683_p10  ;;  %s316_s3 = int_to_ptr.vmem [resolvable:$true] %s315_s3 }
  0x6c   : > { %s1217_s15 = scalar_lea.vmem %s316_s3, 64  ;;  %s1333_s1 = smov [#allocation9]  }
  0x6d   : > { %p1218_p8 = scmp.ne.s32.totalorder %s316_s3, %s1217_s15  ;;  %s1222_s4 = sshll.u32 %s1333_s1, 4  ;;  %s1223_s4 = int_to_ptr.vmem [resolvable:$false] %s1222_s4 }
  0x6e   : > { %s1224_s19 = scalar_lea.vmem %s1223_s4, 128  ;;  %p1225_p0 = scmp.lt.s32.totalorder %s316_s3, %s1223_s4 }
  0x6f   : > { %p1220_p3 = pnand %p1218_p8, %p1684_p12  ;;  %p1226_p7 = scmp.lt.s32.totalorder %s1224_s19, %s1217_s15 }
  0x71   : > { %p1221_p9 = pneg %p1220_p3  ;;  %p1227_p10 = por %p1226_p7, %p1225_p0 }
  0x73   : > { %p1228_p13 = pnand %p1227_p10, %p1221_p9 }
  0x75   : > { %1231 = shalt.err (!%p1228_p13)
}
  0x76   : > { %992 = dma.hbm_to_vmem [thread:$0]  (!%p1475_p2), %s313_s16, 64, %s316_s3, %s1485_s25  }
  0x77   : > { %p1685_p5 = scmp.ne.s32.totalorder %s1668_s7, 0 }
  0x78   : > { %s1543_s28 = sand.u32 (!%p1685_p5), 1, %s1308_s22   ;;  %p1686_p11 = scmp.ne.s32.totalorder (!%p1685_p5), %s1666_s29, 0 }
  0x79   : > { %324 = sbr.rel (%p1685_p5) target bundleno = 919 (0x397), region = 44  ;;  %s1546_s8 = sshll.u32 (!%p1685_p5), %s1543_s28, 2 }
  0x7a   : > { %s327_s9 = scalar_lea.sflag (!%p1685_p5), [#allocation5], %s1543_s28  ;;  %s330_s20 = scalar_lea.vmem (!%p1685_p5), [#allocation4], %s1546_s8 }
  0x7e   : > { %1283 = dma.done.wait (%p1686_p11), %s327_s9, 64  }
  0x7f   : > { %1285 = vsyncadd (%p1686_p11), %s327_s9, 4294967232  ;;  %s335_s25 = sand.u32 1, %s1403_s27   ;;  %s339_s12 = scalar_lea.vmem [#allocation7], %s1546_s8 }
  0x80   : > { %s336_s7 = scalar_lea.sflag [#allocation8], %s335_s25 }
  0x81   : > { %1287 = dma.done.wait (%p1686_p11), %s336_s7, 128  }
  0x82   : > { %1289 = vsyncadd (%p1686_p11), %s336_s7, 4294967168  ;;  %s348_s10 = scalar_lea.vmem [#allocation9], %s1546_s8  ;;  %p1687_p2 = scmp.eq.s32.totalorder %s1403_s27, 0 }
  0x84   : > { %1291 = dma.done.wait (%p1687_p2), [#allocation11], 512   ;;  %p1688_p1 = pmov %p1687_p2 }
  0x86   : > { %1293 = vsyncadd (%p1688_p1), [#allocation11], 4294966784  ;;  %p1689_p6 = pmov %p1688_p1 }
  0x87   : > { %p1690_p4 = pmov %p1688_p1 }
  0x88   : > { %1295 = dma.done.wait (%p1689_p6), [#allocation14], 256  }
  0x89   : > { %1297 = vsyncadd (%p1690_p4), [#allocation14], 4294967040  ;;  %v1334_v0 = vmov 0.0   ;;  %vm1335_vm0 = vmmov 0   ;;  %v1060_v1 = vld [vmem:[#allocation12 + $0x8] sm:$0xff]   ;;  %v1061_v2 = vld [vmem:[#allocation12] sm:$0xff]  }
  0x8a   : > { %917 = vmatprep.subr.bf16.mxu0 %v1334_v0  ;;  %921 = vmatprep.mubr.msk.bf16.mxu0 %vm1335_vm0, %v1334_v0  ;;  %v1064_v3 = vld [vmem:[#allocation13 + $0x8] sm:$0xff]   ;;  %v404_v4 = vld [vmem:[%s339_s12] sm:$0xf]  ;;  %vm421_vm1 = vcmask 261120   ;;  %v1063_v6 = vld [vmem:[#allocation10] sm:$0xff]   ;;  %vm526_vm2 = vcmask 257024  }
  0x8b   : > { %925 = vmatprep.subr.bf16.mxu1 %v1334_v0  ;;  %929 = vmatprep.mubr.msk.bf16.mxu1 %vm1335_vm0, %v1334_v0  ;;  %v1062_v5 = vld [vmem:[#allocation10 + $0x8] sm:$0xff]   ;;  %v1065_v8 = vld [vmem:[#allocation13] sm:$0xff]   ;;  %v465_v9 = vld [vmem:[%s348_s10] sm:$0xf]  ;;  %vm654_vm3 = vcmask 1043456   ;;  %vm639_vm4 = vcmask 64512  }
  0x8c   : > { %918 = vmatpush3.bf16.msra.mxu0 %v1060_v1  ;;  %926 = vmatpush3.bf16.msra.mxu1 %v1064_v3  ;;  %v530_v7 = vld [vmem:[%s330_s20] sm:$0xf]  ;;  %s888_s27 = sshll.u32 %s1543_s28, 3  ;;  %s901_s29 = sshll.u32 %s1316_s24, 7 }
  0x8d   : > { %919 = vmatprep.subr.bf16.mxu0 %v1334_v0  ;;  %927 = vmatprep.subr.bf16.mxu1 %v1334_v0  ;;  %s398_s11 = scalar_lea.vmem [#allocation15], %s888_s27  ;;  %s1590_s16 = scalar_lea.hbm %s1645_s6, %s901_s29 }
  0x8e   : > { %s716_s17 = sshll.u32 %s398_s11, 4  ;;  %s702_s24 = scalar_lea.sflag [#allocation6], %s1543_s28  ;;  %s1592_s17 = int_to_ptr.vmem [resolvable:$true] %s716_s17 }
  0x8f   : > { %s1232_s13 = scalar_lea.vmem %s1592_s17, 128  ;;  %p1691_p12 = scmp.ne.s32.totalorder %s1673_s18, 0 }
  0x90   : > { %920 = vmatpush3.bf16.msra.mxu0 %v1061_v2  ;;  %928 = vmatpush3.bf16.msra.mxu1 %v1065_v8  ;;  %p1233_p8 = scmp.ne.s32.totalorder %s1592_s17, %s1232_s13  ;;  %s1336_s3 = smov [#allocation15]  }
  0x91   : > { %933 = vmatprep.subr.bf16.mxu0 %v1334_v0  ;;  %941 = vmatprep.subr.bf16.mxu1 %v1334_v0  ;;  %s1236_s15 = sshll.u32 %s1336_s3, 4  ;;  %s1237_s15 = int_to_ptr.vmem [resolvable:$false] %s1236_s15 }
  0x92   : > { %p1234_p3 = pnand %p1233_p8, %p1691_p12  ;;  %s1238_s1 = scalar_lea.vmem %s1237_s15, 256 }
  0x93   : > { %922 = vmatmul.mubr.msk.bf16.vlgmr.msra.gmra.mxu0 %vm421_vm1, %v404_v4  ;;  %930 = vmatmul.mubr.msk.bf16.vlgmr.msra.gmra.mxu1 %vm421_vm1, %v465_v9  ;;  %p1239_p0 = scmp.lt.s32.totalorder %s1592_s17, %s1237_s15  ;;  %p1240_p7 = scmp.lt.s32.totalorder %s1238_s1, %s1232_s13 }
  0x94   : > { %934 = vmatpush3.bf16.msra.mxu0 %v1062_v5  ;;  %937 = vmatprep.mubr.msk.bf16.mxu0 %vm1335_vm0, %v1334_v0  ;;  %p1235_p9 = pneg %p1234_p3 }
  0x95   : > { %935 = vmatprep.subr.bf16.mxu0 %v1334_v0  ;;  %943 = vmatprep.mubr.msk.bf16.mxu1 %vm1335_vm0, %v1334_v0  ;;  %p1241_p10 = por %p1240_p7, %p1239_p0 }
  0x97   : > { %p1242_p13 = pnand %p1241_p10, %p1235_p9 }
  0x98   : > { %936 = vmatpush3.bf16.msra.mxu0 %v1063_v6 }
  0x99   : > { %947 = vmatprep.subr.bf16.mxu0 %v1334_v0 }
  0x9b   : > { %938 = vmatmul.mubr.msk.bf16.vlgmr.msra.gmra.mxu0 %vm421_vm1, %v530_v7 }
  0x9c   : > { %949 = vmatprep.mubr.msk.bf16.mxu0 %vm1335_vm0, %v1334_v0 }
 0x153   : > { %v459_v10 = vpop.f32.mrf.mxu0  ;;  %v519_v22 = vpop.f32.mrf.mxu1 }
 0x154   : > { %v525_v11 = vpack.c.bf16 %v459_v10, %v459_v10  ;;  %v528_v23 = vpack.c.bf16 %v519_v22, %v519_v22 }
 0x155   : > { %v923_v12 = vpop.f32.mrf.mxu0  ;;  %v931_v24 = vpop.f32.mrf.mxu1 }
 0x156   : > { %527 = vst.msk [vmem:[#allocation2] sm:$0xf] %vm526_vm2, %v525_v11  ;;  %529 = vst.msk [vmem:[#allocation3] sm:$0xf] %vm526_vm2, %v528_v23 }
 0x157   : > { %v462_v13 = vpop.f32.mrf.mxu0  ;;  %v522_v25 = vpop.f32.mrf.mxu1 }
 0x159   : > { %v924_v14 = vpop.f32.mrf.mxu0  ;;  %v932_v26 = vpop.f32.mrf.mxu1 }
 0x15b   : > { %v585_v15 = vpop.f32.mrf.mxu0 }
 0x15c   : > { %v591_v21 = vpack.c.bf16 %v585_v15, %v585_v15 }
 0x15d   : > { %v592_v16 = vld [vmem:[#allocation2] sm:$0xf]  ;;  %v939_v17 = vpop.f32.mrf.mxu0  ;;  %v650_v27 = vld [vmem:[#allocation3] sm:$0xf] }
 0x15e   : > { %v597_v18 = vsel %vm421_vm1, %v592_v16, 0  ;;  %v656_v28 = vsel %vm654_vm3, %v650_v27, 0 }
 0x15f   : > { %942 = vmatpush3.bf16.xpose.msra.mxu1 %v597_v18  ;;  %v588_v19 = vpop.f32.mrf.mxu0  ;;  %948 = vmatpush3.bf16.msra.mxu0 %v656_v28 }
 0x161   : > { %v940_v20 = vpop.f32.mrf.mxu0 }
 0x166   : > { %944 = vmatmul.mubr.msk.bf16.vlgmr.msra.gmra.mxu1 %vm421_vm1, %v591_v21 }
 0x226   : > { %v633_v29 = vpop.f32.mrf.mxu1 }
 0x227   : > { %v640_v30 = vsel %vm639_vm4, %v633_v29, -inf }
 0x228   : > { %641 = vmax.xlane.f32.xlu0 %v640_v30  ;;  %v945_v31 = vpop.f32.mrf.mxu1 }
 0x22a   : > { %v636_v32 = vpop.f32.mrf.mxu1 }
 0x22c   : > { %v946_v33 = vpop.f32.mrf.mxu1 }
 0x2b1   : > { %v642_v34 = vpop.xlane.xlu0 %641 }
 0x2b2   : > { %v643_v35 = vsub.f32 %v633_v29, %v642_v34 }
 0x2b4   : > { %v644_v36 = vmul.f32 1.442695, %v643_v35 }
 0x2b6   : > { %1066 = vpow2.f32 %v644_v36 }
 0x2c3   : > { %v1067_v37 = vpop.eup %1066 }
 0x2c4   : > { %v646_v38 = vsel %vm639_vm4, %v1067_v37, 0.0  ;;  %v649_v39 = vpack.c.bf16 %v1067_v37, %v1067_v37 }
 0x2c5   : > { %647 = vadd.xlane.f32.xlu0 %v646_v38 }
 0x2c6   : > { %950 = vmatmul.mubr.msk.bf16.vlgmr.msra.gmra.mxu0 %vm639_vm4, %v649_v39 }
 0x34e   : > { %v648_v40 = vpop.xlane.xlu0 %647 }
 0x34f   : > { %1068 = vrcp.f32 %v648_v40 }
 0x35c   : > { %v1069_v41 = vpop.eup %1068 }
 0x386   : > { %v692_v42 = vpop.f32.mrf.mxu0 }
 0x387   : > { %v699_v43 = vmul.f32 %v1069_v41, %v692_v42 }
 0x388   : > { %v951_v44 = vpop.f32.mrf.mxu0 }
 0x389   : > { %700 = vst.msk [vmem:[%s398_s11] sm:$0xff] %vm421_vm1, %v699_v43 }
 0x38a   : > { %v695_v45 = vpop.f32.mrf.mxu0 }
 0x38b   : > { %1245 = shalt.err (!%p1242_p13)
}
 0x38c   : > { %s1246_s4 = scalar_lea.hbm %s1590_s16, 128  ;;  %s1250_s8 = scalar_lea.hbm %s1645_s6, 256 }
 0x38d   : > { %p1247_p5 = scmp.ne.s32.totalorder %s1590_s16, %s1246_s4  ;;  %p1251_p1 = scmp.lt.s32.totalorder %s1590_s16, %s1645_s6 }
 0x38e   : > { %p1252_p6 = scmp.lt.s32.totalorder %s1250_s8, %s1246_s4 }
 0x38f   : > { %p1248_p11 = pnand %p1247_p5, %p1691_p12 }
 0x390   : > { %p1253_p4 = por %p1252_p6, %p1251_p1 }
 0x391   : > { %p1249_p2 = pneg %p1248_p11 }
 0x393   : > { %p1254_p8 = pnand %p1253_p4, %p1249_p2 }
 0x395   : > { %1257 = shalt.err (!%p1254_p8)
}
 0x396   : > { %971 = dma.vmem_to_hbm [thread:$0]  (%p1691_p12), %s1592_s17, 128, %s1590_s16, %s702_s24   ;;  %v952_v46 = vpop.f32.mrf.mxu0 }
 0x397 PF: > { %s1692_s25 = sld [smem:[#allocation22_spill]]  ;;  %s728_s7 = sand.u32 1, %s1304_s21  }
 0x398   : > { %p1693_p3 = scmp.ne.s32.totalorder %s1667_s30, 0  ;;  %s729_s12 = scalar_lea.sflag [#allocation6], %s728_s7 }
 0x39d   : > { %p1694_p9 = scmp.ge.s32.totalorder %s1692_s25, 2 }
 0x39f   : > { %p994_p0 = pnand %p1694_p9, %p1693_p3 }
 0x3a1   : > { %p995_p7 = pneg %p994_p0 }
 0x3a3   : > { %1299 = dma.done.wait (%p995_p7), %s729_s12, 128  }
 0x3a4   : > { %1301 = vsyncadd (%p995_p7), %s729_s12, 4294967168  ;;  %s27_s26 = sadd.s32 1, %s1692_s25   ;;  %s1695_s18 = sld [smem:[#allocation24_spill]] }
 0x3a5   : > { %p24_p10 = scmp.ge.s32.totalorder %s27_s26, 4   ;;  %s1696_s24 = sld [smem:[#allocation21_spill]] }
 0x3a6   : > { %s1697_s25 = sld [smem:[#allocation23_spill]]  ;;  %s1698_s21 = smov %s1308_s22 }
 0x3a7   : > { %s1699_s22 = smov %s1312_s23  ;;  %26 = sbr.rel (!%p24_p10) target bundleno = 14 (0xe), region = 129 }
 0x3aa   : > { %s1700_s23 = smov %s1695_s18 }
 0x3ac   :  { %734 = vsyncpa [#allocation5], 1 }
 0x3ad   :  { %736 = vsyncpa [#allocation5 + $0x1], 1 }
 0x3ae   :  { %737 = vsyncpa [#allocation8], 1 }
 0x3af   :  { %739 = vsyncpa [#allocation8 + $0x1], 1 }
 0x3b0   :  { %740 = vsyncpa [#allocation11], 1 }
 0x3b1   :  { %741 = vsyncpa [#allocation14], 1 }
 0x3b2   :  { %742 = vsyncpa [#allocation6], 1 }
 0x3b3   :  { %744 = vsyncpa [#allocation6 + $0x1], 1 }

</bundles_post_ra>
